<compile_context>
chip_gen: v6e
topology: v6e:2x2x1
jax: 0.10.0
libtpu: 0.0.40
codegen_flags: <defaults>
</compile_context>

<pallas_src>
import functools

import jax
import jax.numpy as jnp
import numpy as np
from jax.experimental import pallas as pl
from jax.experimental.pallas import tpu as pltpu


def _tree_add(vals):
    """Pairwise-tree sum of a Python list of arrays (no serial add chain)."""
    vals = list(vals)
    while len(vals) > 1:
        nxt = [vals[i] + vals[i + 1] for i in range(0, len(vals) - 1, 2)]
        if len(vals) % 2 == 1:
            nxt.append(vals[-1])
        vals = nxt
    return vals[0]


# -----------------------------------------------------------------------------
# Fused kernel: (im2col-free) conv + bias + ReLU + FC + bias, block_n samples
# per grid step.
#   x_ref  : (block_n, C_in, 326)   zero-padded input rows, flattened, +guards
#   w36_ref: (C_out, 9*C_in)        conv weight, tap-major columns (kh,kw,c)
#   cb_ref : (C_out, 1)             conv bias
#   fw_ref : (288, C_out*classes)   block-diagonal packed FC weight (zeros on
#                                   the 32 padding columns of the flat grid)
#   fb_ref : (1, classes)           fc bias
#   o_ref  : (block_n, 1, classes)  logits
# -----------------------------------------------------------------------------
def fused_forward_kernel(x_ref, w36_ref, cb_ref, fw_ref, fb_ref, o_ref, *,
                         ksz, wp):
    nb = x_ref.shape[0]
    c_in = x_ref.shape[1]
    c_out = cb_ref.shape[0]
    q_len = fw_ref.shape[0]          # H * (W + 2) = 288
    n_cls = fb_ref.shape[1]

    w36 = w36_ref[...]
    cb = cb_ref[...]
    fb = fb_ref[...]
    fw = fw_ref[...]

    # Flat-domain shift for tap (kh, kw): input index = q + (wp*kh + kw - 1),
    # and the +1 front guard makes the slice start exactly wp*kh + kw.
    offs = [kh * wp + kw for kh in range(ksz) for kw in range(ksz)]

    hs = []
    for n in range(nb):                               # unrolled, nb <= 8
        xn = x_ref[n]                                 # (c_in, 326)
        parts = []
        for k, s in enumerate(offs):                  # 9 taps, independent dots
            wk = w36[:, k * c_in:(k + 1) * c_in]      # (c_out, c_in)
            pk = xn[:, s:s + q_len]                   # (c_in, 288) static slice
            parts.append(jnp.dot(wk, pk, preferred_element_type=jnp.float32))
        # conv + bias + ReLU (garbage in the 32 pad columns is harmless: the
        # matching FC weight rows are zero)
        h = jnp.maximum(_tree_add(parts) + cb, 0.0)   # (c_out, 288)
        hs.append(h)
    hblk = hs[0] if nb == 1 else jnp.concatenate(hs, axis=0)   # (nb*c_out, 288)

    # Single FC contraction for the whole block: M = nb*c_out, K = 288, N = 80.
    g = jnp.dot(hblk, fw, preferred_element_type=jnp.float32)

    # Extract the block-diagonal (o == o') pieces and tree-sum them per sample.
    for n in range(nb):
        terms = [g[n * c_out + o:n * c_out + o + 1, o * n_cls:(o + 1) * n_cls]
                 for o in range(c_out)]
        o_ref[n] = (_tree_add(terms) + fb).astype(o_ref.dtype)


# -----------------------------------------------------------------------------
# Parameter prep (host-side, once): fold coeff@basis (exact, full-rank SVD) and
# re-pack the weights for the fused kernel.
# -----------------------------------------------------------------------------
def prepare_inference_params(params, *, C_in=4, ksz=3, H=16, W=16):
    # Conv: fold, then tap-major column order (kh, kw, c).
    conv_fold = params["conv_coeff"] @ params["conv_basis"]      # (C_out, C_in*9)
    C_out = conv_fold.shape[0]
    w4 = conv_fold.reshape(C_out, C_in, ksz, ksz)
    conv_w36 = jnp.transpose(w4, (0, 2, 3, 1)).reshape(C_out, ksz * ksz * C_in)
    conv_b = params["conv_bias"].reshape(C_out, 1)

    # FC: fold, then pack block-diagonally on a (H, W+2) flat grid:
    #   fw_big[h*(W+2) + (w+1), o*classes + cls] = W_fc[cls, o, h, w]
    # with zero rows for the padding columns (w+1 in {0, W+1}).
    fc_fold = params["fc_coeff"] @ params["fc_basis"]            # (cls, C_out*H*W)
    num_classes = fc_fold.shape[0]
    fc4 = fc_fold.reshape(num_classes, C_out, H, W)
    fw_hw = jnp.transpose(fc4, (2, 3, 1, 0)).reshape(H, W, C_out * num_classes)
    fw_pad = jnp.pad(fw_hw, ((0, 0), (1, 1), (0, 0)))            # (H, W+2, 80)
    fw_big = fw_pad.reshape(H * (W + 2), C_out * num_classes)    # (288, 80)
    fc_b = params["fc_bias"].reshape(1, num_classes)

    return {"conv_w36": conv_w36, "conv_b": conv_b,
            "fw_big": fw_big, "fc_b": fc_b}


# -----------------------------------------------------------------------------
# Full forward: cheap host-side pad/flatten (~1.3x input bytes) + one fused
# pallas_call over sample blocks.
# -----------------------------------------------------------------------------
def base_model_forward(x_nchw, prep, block_n=None):
    N, C, H, W = x_nchw.shape
    ksz = 3
    wp = W + 2

    # Pad H and W by 1, flatten padded rows, add 1 guard element each end so
    # every conv tap is a pure static lane-shift in the kernel.
    xp = jnp.pad(x_nchw, ((0, 0), (0, 0), (1, 1), (1, 1)))       # (N, C, 18, 18)
    xflat = xp.reshape(N, C, (H + 2) * wp)                       # (N, C, 324)
    xext = jnp.pad(xflat, ((0, 0), (0, 0), (1, 1)))              # (N, C, 326)

    # Grid shaping: keep >= 2 parallel steps when N >= 2 (v7x dual TC), batch
    # up to 8 samples per step to amortize per-step pipeline overhead.
    if block_n is None:
        block_n = max(1, min(8, pl.cdiv(N, 2)))
    n_steps = pl.cdiv(N, block_n)
    n_pad = n_steps * block_n
    if n_pad != N:
        xext = jnp.pad(xext, ((0, n_pad - N), (0, 0), (0, 0)))

    L = xext.shape[-1]
    q_len = prep["fw_big"].shape[0]
    c_out = prep["conv_b"].shape[0]
    num_classes = prep["fc_b"].shape[1]

    out = pl.pallas_call(
        functools.partial(fused_forward_kernel, ksz=ksz, wp=wp),
        out_shape=jax.ShapeDtypeStruct((n_pad, 1, num_classes), x_nchw.dtype),
        grid_spec=pltpu.PrefetchScalarGridSpec(
            num_scalar_prefetch=0,
            grid=(n_steps,),
            in_specs=[
                pl.BlockSpec((block_n, C, L), lambda i: (i, 0, 0)),   # input
                # Weight blocks use constant index maps -> fetched once, not
                # re-DMA'd per grid step (no per-step double-buffer traffic).
                pl.BlockSpec((c_out, ksz * ksz * C), lambda i: (0, 0)),
                pl.BlockSpec((c_out, 1), lambda i: (0, 0)),
                pl.BlockSpec((q_len, c_out * num_classes), lambda i: (0, 0)),
                pl.BlockSpec((1, num_classes), lambda i: (0, 0)),
            ],
            out_specs=pl.BlockSpec((block_n, 1, num_classes),
                                   lambda i: (i, 0, 0)),
        ),
        compiler_params=pltpu.CompilerParams(
            dimension_semantics=("parallel",)),
    )(xext, prep["conv_w36"], prep["conv_b"], prep["fw_big"], prep["fc_b"])

    return out[:N].reshape(N, num_classes)


# -----------------------------------------------------------------------------
# Parameter construction (original weights + exact SVD basis decomposition) and
# a plain-JAX reference with the ORIGINAL (undecomposed) weights.
# -----------------------------------------------------------------------------
def svd_basis(w2d, basis_channels):
    """W (out, K) -> basis (r, K), coeff (out, r), coeff @ basis == W (exact)."""
    u, s, vh = np.linalg.svd(np.asarray(w2d, dtype=np.float64),
                             full_matrices=False)
    r = basis_channels
    basis = vh[:r]
    coeff = u[:, :r] * s[:r][None, :]
    return (jnp.asarray(basis, jnp.float32), jnp.asarray(coeff, jnp.float32))


def make_params(key):
    k1, k2, k3, k4 = jax.random.split(key, 4)
    C_in, C_out, ksz = 4, 8, 3
    H, W = 16, 16
    num_classes = 10

    conv_w = jax.random.normal(k1, (C_out, C_in, ksz, ksz), jnp.float32) * 0.1
    conv_b = jax.random.normal(k2, (C_out,), jnp.float32) * 0.05
    fc_in = C_out * H * W
    fc_w = jax.random.normal(k3, (num_classes, fc_in), jnp.float32) * 0.02
    fc_b = jax.random.normal(k4, (num_classes,), jnp.float32) * 0.05

    conv_basis_ch = min(C_out, C_in * ksz * ksz)          # = 8
    fc_basis_ch = min(num_classes, fc_in)                 # = 10

    conv_basis, conv_coeff = svd_basis(conv_w.reshape(C_out, -1), conv_basis_ch)
    fc_basis, fc_coeff = svd_basis(fc_w, fc_basis_ch)

    return {
        "conv_w": conv_w, "conv_bias": conv_b,
        "conv_basis": conv_basis, "conv_coeff": conv_coeff,
        "fc_w": fc_w, "fc_bias": fc_b,
        "fc_basis": fc_basis, "fc_coeff": fc_coeff,
        # baseModel registered buffers (bookkeeping only)
        "num_original_filters": jnp.array([C_out, num_classes], jnp.int32),
        "num_basis_filters": jnp.array([conv_basis_ch, fc_basis_ch], jnp.int32),
        "num_layers": jnp.array([2], jnp.int32),
    }


def reference_forward(x_nchw, params):
    y = jax.lax.conv_general_dilated(
        x_nchw, params["conv_w"], window_strides=(1, 1), padding="SAME",
        dimension_numbers=("NCHW", "OIHW", "NCHW"))
    y = y + params["conv_bias"][None, :, None, None]
    y = jnp.maximum(y, 0.0)
    flat = y.reshape(y.shape[0], -1)
    return flat @ params["fc_w"].T + params["fc_bias"][None, :]


# TODO(synk): baseModel's pruning/bookkeeping methods (update_channels,
# get_flops, randomize_filters, cuda/cpu) are host-side utilities with no
# forward-pass Pallas equivalent; only the forward is implemented here.
# (bf16 MXU inputs were considered for v6e/v7x but kept f32 for v5e VPU
#  compatibility and the 1e-4 test tolerance.)

if __name__ == "__main__":
    key = jax.random.PRNGKey(0)
    pkey, xkey = jax.random.split(key)
    params = make_params(pkey)
    prep = prepare_inference_params(params)

    x = jax.random.normal(xkey, (2, 4, 16, 16), jnp.float32)   # NCHW

    fwd = jax.jit(base_model_forward)
    out = jax.block_until_ready(fwd(x, prep))

    ref = jax.block_until_ready(reference_forward(x, params))
    np.testing.assert_allclose(np.asarray(out), np.asarray(ref),
                               rtol=1e-4, atol=5e-4)

    print("KERNEL_OK")
</pallas_src>

<mosaic_0001>
module attributes {stable_mosaic.version = 11 : i64} {
  func.func @fused_forward_kernel(%arg0: i32, %arg1: memref<1x4x326xf32, #tpu.memory_space<vmem>>, %arg2: memref<8x36xf32, #tpu.memory_space<vmem>>, %arg3: memref<8x1xf32, #tpu.memory_space<vmem>>, %arg4: memref<288x80xf32, #tpu.memory_space<vmem>>, %arg5: memref<1x10xf32, #tpu.memory_space<vmem>>, %arg6: memref<1x1x10xf32, #tpu.memory_space<vmem>>) attributes {dimension_semantics = [#tpu.dimension_semantics<parallel>], iteration_bounds = array<i64: 2>, scalar_prefetch = 0 : i64, scratch_operands = 0 : i64, tpu.core_type = #tpu.core_type<tc>, window_params = [{transform_indices = @transform_0, window_bounds = array<i64: 1, 4, 326>}, {pipeline_mode = #tpu.pipeline_mode<synchronous>, transform_indices = @transform_1, window_bounds = array<i64: 8, 36>}, {pipeline_mode = #tpu.pipeline_mode<synchronous>, transform_indices = @transform_2, window_bounds = array<i64: 8, 1>}, {pipeline_mode = #tpu.pipeline_mode<synchronous>, transform_indices = @transform_3, window_bounds = array<i64: 288, 80>}, {pipeline_mode = #tpu.pipeline_mode<synchronous>, transform_indices = @transform_4, window_bounds = array<i64: 1, 10>}, {transform_indices = @transform_5, window_bounds = array<i64: 1, 1, 10>}]} {
    %c0 = arith.constant 0 : index
    %c0_0 = arith.constant 0 : index
    %0 = vector.load %arg2[%c0, %c0_0] : memref<8x36xf32, #tpu.memory_space<vmem>>, vector<8x36xf32>
    %c0_1 = arith.constant 0 : index
    %c0_2 = arith.constant 0 : index
    %1 = vector.load %arg3[%c0_1, %c0_2] : memref<8x1xf32, #tpu.memory_space<vmem>>, vector<8x1xf32>
    %c0_3 = arith.constant 0 : index
    %c0_4 = arith.constant 0 : index
    %2 = vector.load %arg5[%c0_3, %c0_4] : memref<1x10xf32, #tpu.memory_space<vmem>>, vector<1x10xf32>
    %c0_5 = arith.constant 0 : index
    %c0_6 = arith.constant 0 : index
    %3 = vector.load %arg4[%c0_5, %c0_6] : memref<288x80xf32, #tpu.memory_space<vmem>>, vector<288x80xf32>
    %c0_7 = arith.constant 0 : index
    %c0_8 = arith.constant 0 : index
    %c0_9 = arith.constant 0 : index
    %4 = vector.load %arg1[%c0_7, %c0_8, %c0_9] : memref<1x4x326xf32, #tpu.memory_space<vmem>>, vector<1x4x326xf32>
    %5 = vector.shape_cast %4 : vector<1x4x326xf32> to vector<4x326xf32>
    %6 = vector.extract_strided_slice %0 {offsets = [0, 0], sizes = [8, 4], strides = [1, 1]} : vector<8x36xf32> to vector<8x4xf32>
    %7 = vector.extract_strided_slice %5 {offsets = [0, 0], sizes = [4, 288], strides = [1, 1]} : vector<4x326xf32> to vector<4x288xf32>
    %cst = arith.constant dense<0.000000e+00> : vector<8x288xf32>
    %8 = tpu.matmul %6, %7, %cst {dimension_numbers = #tpu.dot_dimension_numbers<[1], [0], [0], [1], [0, 0, 1, 1], [], []>} : vector<8x4xf32>, vector<4x288xf32>, vector<8x288xf32> -> vector<8x288xf32>
    %9 = vector.extract_strided_slice %0 {offsets = [0, 4], sizes = [8, 4], strides = [1, 1]} : vector<8x36xf32> to vector<8x4xf32>
    %10 = vector.extract_strided_slice %5 {offsets = [0, 1], sizes = [4, 288], strides = [1, 1]} : vector<4x326xf32> to vector<4x288xf32>
    %cst_10 = arith.constant dense<0.000000e+00> : vector<8x288xf32>
    %11 = tpu.matmul %9, %10, %cst_10 {dimension_numbers = #tpu.dot_dimension_numbers<[1], [0], [0], [1], [0, 0, 1, 1], [], []>} : vector<8x4xf32>, vector<4x288xf32>, vector<8x288xf32> -> vector<8x288xf32>
    %12 = vector.extract_strided_slice %0 {offsets = [0, 8], sizes = [8, 4], strides = [1, 1]} : vector<8x36xf32> to vector<8x4xf32>
    %13 = vector.extract_strided_slice %5 {offsets = [0, 2], sizes = [4, 288], strides = [1, 1]} : vector<4x326xf32> to vector<4x288xf32>
    %cst_11 = arith.constant dense<0.000000e+00> : vector<8x288xf32>
    %14 = tpu.matmul %12, %13, %cst_11 {dimension_numbers = #tpu.dot_dimension_numbers<[1], [0], [0], [1], [0, 0, 1, 1], [], []>} : vector<8x4xf32>, vector<4x288xf32>, vector<8x288xf32> -> vector<8x288xf32>
    %15 = vector.extract_strided_slice %0 {offsets = [0, 12], sizes = [8, 4], strides = [1, 1]} : vector<8x36xf32> to vector<8x4xf32>
    %16 = vector.extract_strided_slice %5 {offsets = [0, 18], sizes = [4, 288], strides = [1, 1]} : vector<4x326xf32> to vector<4x288xf32>
    %cst_12 = arith.constant dense<0.000000e+00> : vector<8x288xf32>
    %17 = tpu.matmul %15, %16, %cst_12 {dimension_numbers = #tpu.dot_dimension_numbers<[1], [0], [0], [1], [0, 0, 1, 1], [], []>} : vector<8x4xf32>, vector<4x288xf32>, vector<8x288xf32> -> vector<8x288xf32>
    %18 = vector.extract_strided_slice %0 {offsets = [0, 16], sizes = [8, 4], strides = [1, 1]} : vector<8x36xf32> to vector<8x4xf32>
    %19 = vector.extract_strided_slice %5 {offsets = [0, 19], sizes = [4, 288], strides = [1, 1]} : vector<4x326xf32> to vector<4x288xf32>
    %cst_13 = arith.constant dense<0.000000e+00> : vector<8x288xf32>
    %20 = tpu.matmul %18, %19, %cst_13 {dimension_numbers = #tpu.dot_dimension_numbers<[1], [0], [0], [1], [0, 0, 1, 1], [], []>} : vector<8x4xf32>, vector<4x288xf32>, vector<8x288xf32> -> vector<8x288xf32>
    %21 = vector.extract_strided_slice %0 {offsets = [0, 20], sizes = [8, 4], strides = [1, 1]} : vector<8x36xf32> to vector<8x4xf32>
    %22 = vector.extract_strided_slice %5 {offsets = [0, 20], sizes = [4, 288], strides = [1, 1]} : vector<4x326xf32> to vector<4x288xf32>
    %cst_14 = arith.constant dense<0.000000e+00> : vector<8x288xf32>
    %23 = tpu.matmul %21, %22, %cst_14 {dimension_numbers = #tpu.dot_dimension_numbers<[1], [0], [0], [1], [0, 0, 1, 1], [], []>} : vector<8x4xf32>, vector<4x288xf32>, vector<8x288xf32> -> vector<8x288xf32>
    %24 = vector.extract_strided_slice %0 {offsets = [0, 24], sizes = [8, 4], strides = [1, 1]} : vector<8x36xf32> to vector<8x4xf32>
    %25 = vector.extract_strided_slice %5 {offsets = [0, 36], sizes = [4, 288], strides = [1, 1]} : vector<4x326xf32> to vector<4x288xf32>
    %cst_15 = arith.constant dense<0.000000e+00> : vector<8x288xf32>
    %26 = tpu.matmul %24, %25, %cst_15 {dimension_numbers = #tpu.dot_dimension_numbers<[1], [0], [0], [1], [0, 0, 1, 1], [], []>} : vector<8x4xf32>, vector<4x288xf32>, vector<8x288xf32> -> vector<8x288xf32>
    %27 = vector.extract_strided_slice %0 {offsets = [0, 28], sizes = [8, 4], strides = [1, 1]} : vector<8x36xf32> to vector<8x4xf32>
    %28 = vector.extract_strided_slice %5 {offsets = [0, 37], sizes = [4, 288], strides = [1, 1]} : vector<4x326xf32> to vector<4x288xf32>
    %cst_16 = arith.constant dense<0.000000e+00> : vector<8x288xf32>
    %29 = tpu.matmul %27, %28, %cst_16 {dimension_numbers = #tpu.dot_dimension_numbers<[1], [0], [0], [1], [0, 0, 1, 1], [], []>} : vector<8x4xf32>, vector<4x288xf32>, vector<8x288xf32> -> vector<8x288xf32>
    %30 = vector.extract_strided_slice %0 {offsets = [0, 32], sizes = [8, 4], strides = [1, 1]} : vector<8x36xf32> to vector<8x4xf32>
    %31 = vector.extract_strided_slice %5 {offsets = [0, 38], sizes = [4, 288], strides = [1, 1]} : vector<4x326xf32> to vector<4x288xf32>
    %cst_17 = arith.constant dense<0.000000e+00> : vector<8x288xf32>
    %32 = tpu.matmul %30, %31, %cst_17 {dimension_numbers = #tpu.dot_dimension_numbers<[1], [0], [0], [1], [0, 0, 1, 1], [], []>} : vector<8x4xf32>, vector<4x288xf32>, vector<8x288xf32> -> vector<8x288xf32>
    %33 = arith.addf %8, %11 : vector<8x288xf32>
    %34 = arith.addf %14, %17 : vector<8x288xf32>
    %35 = arith.addf %20, %23 : vector<8x288xf32>
    %36 = arith.addf %26, %29 : vector<8x288xf32>
    %37 = arith.addf %33, %34 : vector<8x288xf32>
    %38 = arith.addf %35, %36 : vector<8x288xf32>
    %39 = arith.addf %37, %38 : vector<8x288xf32>
    %40 = arith.addf %39, %32 : vector<8x288xf32>
    %41 = vector.broadcast %1 : vector<8x1xf32> to vector<8x288xf32>
    %42 = arith.addf %40, %41 : vector<8x288xf32>
    %cst_18 = arith.constant 0.000000e+00 : f32
    %43 = vector.broadcast %cst_18 : f32 to vector<8x288xf32>
    %44 = arith.maximumf %42, %43 : vector<8x288xf32>
    %cst_19 = arith.constant dense<0.000000e+00> : vector<8x80xf32>
    %45 = tpu.matmul %44, %3, %cst_19 {dimension_numbers = #tpu.dot_dimension_numbers<[1], [0], [0], [1], [0, 0, 1, 1], [], []>} : vector<8x288xf32>, vector<288x80xf32>, vector<8x80xf32> -> vector<8x80xf32>
    %46 = vector.extract_strided_slice %45 {offsets = [0, 0], sizes = [1, 10], strides = [1, 1]} : vector<8x80xf32> to vector<1x10xf32>
    %47 = vector.extract_strided_slice %45 {offsets = [1, 10], sizes = [1, 10], strides = [1, 1]} : vector<8x80xf32> to vector<1x10xf32>
    %48 = vector.extract_strided_slice %45 {offsets = [2, 20], sizes = [1, 10], strides = [1, 1]} : vector<8x80xf32> to vector<1x10xf32>
    %49 = vector.extract_strided_slice %45 {offsets = [3, 30], sizes = [1, 10], strides = [1, 1]} : vector<8x80xf32> to vector<1x10xf32>
    %50 = vector.extract_strided_slice %45 {offsets = [4, 40], sizes = [1, 10], strides = [1, 1]} : vector<8x80xf32> to vector<1x10xf32>
    %51 = vector.extract_strided_slice %45 {offsets = [5, 50], sizes = [1, 10], strides = [1, 1]} : vector<8x80xf32> to vector<1x10xf32>
    %52 = vector.extract_strided_slice %45 {offsets = [6, 60], sizes = [1, 10], strides = [1, 1]} : vector<8x80xf32> to vector<1x10xf32>
    %53 = vector.extract_strided_slice %45 {offsets = [7, 70], sizes = [1, 10], strides = [1, 1]} : vector<8x80xf32> to vector<1x10xf32>
    %54 = arith.addf %46, %47 : vector<1x10xf32>
    %55 = arith.addf %48, %49 : vector<1x10xf32>
    %56 = arith.addf %50, %51 : vector<1x10xf32>
    %57 = arith.addf %52, %53 : vector<1x10xf32>
    %58 = arith.addf %54, %55 : vector<1x10xf32>
    %59 = arith.addf %56, %57 : vector<1x10xf32>
    %60 = arith.addf %58, %59 : vector<1x10xf32>
    %61 = arith.addf %60, %2 : vector<1x10xf32>
    %c0_20 = arith.constant 0 : index
    %c0_21 = arith.constant 0 : index
    %c0_22 = arith.constant 0 : index
    %62 = vector.load %arg6[%c0_20, %c0_21, %c0_22] : memref<1x1x10xf32, #tpu.memory_space<vmem>>, vector<1x1x10xf32>
    %63 = vector.shape_cast %62 : vector<1x1x10xf32> to vector<1x10xf32>
    %64 = vector.shape_cast %61 : vector<1x10xf32> to vector<1x1x10xf32>
    tpu.vector_store %arg6[%c0_20, %c0_21, %c0_22], %64 {strides = array<i32>} : memref<1x1x10xf32, #tpu.memory_space<vmem>>, vector<1x1x10xf32>,
    return
  }
  func.func @transform_0(%arg0: i32) -> (i32, i32, i32) {
    %c0_i32 = arith.constant 0 : i32
    %c0_i32_0 = arith.constant 0 : i32
    %c0_i32_1 = arith.constant 0 : i32
    return %arg0, %c0_i32, %c0_i32_0 : i32, i32, i32
  }
  func.func @transform_1(%arg0: i32) -> (i32, i32) {
    %c0_i32 = arith.constant 0 : i32
    %c0_i32_0 = arith.constant 0 : i32
    %c0_i32_1 = arith.constant 0 : i32
    return %c0_i32, %c0_i32_0 : i32, i32
  }
  func.func @transform_2(%arg0: i32) -> (i32, i32) {
    %c0_i32 = arith.constant 0 : i32
    %c0_i32_0 = arith.constant 0 : i32
    %c0_i32_1 = arith.constant 0 : i32
    return %c0_i32, %c0_i32_0 : i32, i32
  }
  func.func @transform_3(%arg0: i32) -> (i32, i32) {
    %c0_i32 = arith.constant 0 : i32
    %c0_i32_0 = arith.constant 0 : i32
    %c0_i32_1 = arith.constant 0 : i32
    return %c0_i32, %c0_i32_0 : i32, i32
  }
  func.func @transform_4(%arg0: i32) -> (i32, i32) {
    %c0_i32 = arith.constant 0 : i32
    %c0_i32_0 = arith.constant 0 : i32
    %c0_i32_1 = arith.constant 0 : i32
    return %c0_i32, %c0_i32_0 : i32, i32
  }
  func.func @transform_5(%arg0: i32) -> (i32, i32, i32) {
    %c0_i32 = arith.constant 0 : i32
    %c0_i32_0 = arith.constant 0 : i32
    %c0_i32_1 = arith.constant 0 : i32
    return %arg0, %c0_i32, %c0_i32_0 : i32, i32, i32
  }
}

</mosaic_0001>

<bundles_post_ra>
// kernel: base_model_forward.1
= control target key start
LH: loop header
LB: loop body
LE: loop exit
PB: predicated region body
PF: predicated region fallthrough
CT: control target
= control target key end

     0   :  { %10 = vsyncpa [#allocation3], 0  ;;  %s2642_s0 = inlined_call_operand.vmem [shape: f32[2,4,326], index: 0, kind: input, shape index: {}]   ;;  %s2643_s1 = inlined_call_operand.vmem [shape: f32[8,36], index: 1, kind: input, shape index: {}]   ;;  %s2644_s2 = inlined_call_operand.vmem [shape: f32[8,1], index: 2, kind: input, shape index: {}]   ;;  %s2645_s3 = inlined_call_operand.vmem [shape: f32[288,80], index: 3, kind: input, shape index: {}]   ;;  %s2646_s4 = inlined_call_operand.vmem [shape: f32[1,10], index: 4, kind: input, shape index: {}]   ;;  %s2647_s5 = inlined_call_operand.hbm [shape: f32[2,1,10], index: 5, kind: output, shape index: {}]  }
   0x1   :  { %12 = vsyncpa [#allocation3 + $0x1], 0  ;;  %s2297_s18 = smov 0   ;;  %s2299_s19 = smov 0  }
   0x2   :  { %s2301_s20 = smov 0   ;;  %s2303_s21 = smov 0  }
   0x3 LB: > { %s2318_s22 = sadd.s32 4294967295, %s2244_s21   ;;  %s1954_s23 = sadd.s32 4294967294, %s2244_s21   ;;  %s2244_s21 = sphi %s2303_s21, %s2653_s21   ;;  %s2240_s20 = sphi %s2301_s20, %s2652_s20   ;;  %s2236_s19 = sphi %s2299_s19, %s2651_s19   ;;  %s2232_s18 = sphi %s2297_s18, %s2650_s18  }
   0x4   : > { %s2322_s24 = sadd.s32 1, %s2244_s21   ;;  %s135_s25 = sadd.s32 1, %s2240_s20 }
   0x5   : > { %s132_s26 = ssub.s32 %s2244_s21, %s2322_s24  ;;  %p145_p0 = scmp.ne.s32.totalorder %s2240_s20, %s2236_s19 }
   0x6   : > { %p133_p1 = scmp.eq.s32.totalorder %s132_s26, 0  ;;  %p146_p2 = scmp.eq.s32.totalorder %s2318_s22, 1 }
   0x7   : > { %p151_p3 = scmp.ne.s32.totalorder %s2236_s19, %s2232_s18  ;;  %p152_p4 = scmp.eq.s32.totalorder %s1954_s23, 1 }
   0x8   : > { %s2333_s27 = scalar_select %p133_p1, %s2240_s20, %s135_s25  }
   0x9   : > { %p2335_p5 = por %p146_p2, %p145_p0  ;;  %p2339_p6 = por %p152_p4, %p151_p3 }
   0xa   : > { %p1957_p7 = scmp.ge.s32.totalorder %s2244_s21, 1  ;;  %p190_p8 = scmp.lt.s32.totalorder %s2244_s21, 3 }
   0xc   : > { %p191_p9 = pnand %p1957_p7, %p190_p8 }
   0xd   : > { %p217_p10 = scmp.lt.s32.totalorder (!%p191_p9), %s2318_s22, 1  ;;  %s2246_s7 = smov (!%p191_p9), 124  }
   0xe   : > { %194 = sbr.rel (%p191_p9) target bundleno = 981 (0x3d5), region = 40  ;;  %s2248_s13 = smov (!%p191_p9), 127  }
   0xf   : > { %s2249_s14 = smov (!%p191_p9), 110   ;;  %s2250_s15 = smov (!%p191_p9), 116  }
  0x10   : > { %s2251_s16 = smov (!%p191_p9), 108   ;;  %s2252_s17 = smov (!%p191_p9), 91  }
  0x11   : > { %s2253_s23 = smov (!%p191_p9), 100   ;;  %s2254_s25 = smov (!%p191_p9), 90  }
  0x12   : > { %s2255_s26 = smov (!%p191_p9), 96   ;;  %s2256_s30 = smov (!%p191_p9), 126  }
  0x13   : > { %v2348_v0 = vld [vmem:[%s2643_s1] sm:$0xff]  ;;  %v2247_v1 = vmov 0.0   ;;  %s218_s8 = scalar_select %p217_p10, %s2318_s22, 1  ;;  %v2260_v5 = vmov 0   ;;  %vm275_vm0 = vcmask 1039360   ;;  %vm281_vm1 = vcmask 1043456  }
  0x14   : > { %264 = vrot.lane.b32.xlu1 %v2348_v0, %s2246_s7  ;;  %352 = vmatprep.mubr.f32.mxu1 %v2247_v1  ;;  %s2257_s6 = smov 120   ;;  %s2258_s7 = smov 109   ;;  %v223_v6 = vld [vmem:[%s2644_s2] sm:$0xff]  ;;  %vm278_vm2 = vcmask 31744   ;;  %vm437_vm3 = vcmask 900096   ;;  %vm2263_vm4 = vmmov 0  }
  0x15   : > { %832 = vmatprep.mubr.f32.mxu0 %v2247_v1  ;;  %s2122_s9 = smul.u32 12, %s218_s8  ;;  %s2259_s8 = smov 112   ;;  %2182 = vset.pattern.permute.xlu0 %v2260_v5  ;;  %vm597_vm5 = vcmask 883712   ;;  %vm757_vm6 = vcmask 744448   ;;  %vm917_vm7 = vcmask 736256   ;;  %vm1226_vm8 = vcmask 1031168  }
  0x16   : > { %s2262_s10 = smov 104   ;;  %vm1386_vm9 = vcmask 891904   ;;  %vm1546_vm10 = vcmask 752640   ;;  %v256_v55 = vld [vmem:[%s2645_s3 + $0xf8] sm:$0xff]  ;;  %v255_v57 = vld [vmem:[%s2645_s3 + $0xf0] sm:$0xff]  ;;  %v254_v59 = vld [vmem:[%s2645_s3 + $0xe8] sm:$0xff] }
  0x17   : > { %s221_s12 = scalar_lea.vmem %s2642_s0, %s2122_s9  ;;  %s2261_s9 = smov 92   ;;  %v240_v56 = vld [vmem:[%s2645_s3 + $0x78] sm:$0xff]  ;;  %v239_v58 = vld [vmem:[%s2645_s3 + $0x70] sm:$0xff]  ;;  %v238_v60 = vld [vmem:[%s2645_s3 + $0x68] sm:$0xff]  ;;  %vm1721_vm11 = vcmask 261120   ;;  %vm1884_vm12 = vcmask 73728  }
  0x18   : > { %v2358_v2 = vld [vmem:[%s221_s12 + $0x8] sm:$0xf]  ;;  %v2360_v3 = vld [vmem:[%s221_s12] sm:$0xff]  ;;  %v252_v63 = vld [vmem:[%s2645_s3 + $0xd8] sm:$0xff]  ;;  %s2265_s11 = smov 88   ;;  %s215_s12 = sand.u32 1, %s2236_s19  }
  0x19   : > { %273 = vrot.lane.b32.xlu0 %v2358_v2, %s2248_s13  ;;  %269 = vrot.lane.b32.xlu1 %v2360_v3, %s2248_s13  ;;  %v2366_v4 = vcombine.high %v2360_v3, %v2360_v3  ;;  %v253_v61 = vld [vmem:[%s2645_s3 + $0xe0] sm:$0xff]  ;;  %v234_v5 = vld [vmem:[%s2645_s3 + $0x48] sm:$0xff] }
  0x1a   : > { %v237_v62 = vld [vmem:[%s2645_s3 + $0x60] sm:$0xff] }
  0x1d   : > { %435 = vrot.lane.b32.xlu1 %v2358_v2, %s2249_s14  ;;  %271 = vrot.lane.b32.xlu0 %v2366_v4, %s2248_s13 }
  0x21   : > { %429 = vrot.lane.b32.xlu1 %v2348_v0, %s2250_s15  ;;  %433 = vrot.lane.b32.xlu0 %v2366_v4, %s2249_s14  ;;  %s2005_s15 = sshll.u32 %s2318_s22, 4 }
  0x25   : > { %595 = vrot.lane.b32.xlu1 %v2358_v2, %s2251_s16  ;;  %431 = vrot.lane.b32.xlu0 %v2360_v3, %s2249_s14 }
  0x29   : > { %753 = vrot.lane.b32.xlu1 %v2366_v4, %s2252_s17  ;;  %593 = vrot.lane.b32.xlu0 %v2366_v4, %s2251_s16 }
  0x2d   : > { %751 = vrot.lane.b32.xlu1 %v2360_v3, %s2252_s17  ;;  %591 = vrot.lane.b32.xlu0 %v2360_v3, %s2251_s16 }
  0x31   : > { %749 = vrot.lane.b32.xlu1 %v2348_v0, %s2253_s23  ;;  %755 = vrot.lane.b32.xlu0 %v2358_v2, %s2252_s17  ;;  %s216_s17 = scalar_lea.vmem [#allocation2], %s215_s12 }
  0x32   : > { %s1899_s23 = sshll.u32 %s216_s17, 4  ;;  %s1900_s23 = int_to_ptr.vmem [resolvable:$true] %s1899_s23 }
  0x35   : > { %915 = vrot.lane.b32.xlu1 %v2358_v2, %s2254_s25  ;;  %589 = vrot.lane.b32.xlu0 %v2348_v0, %s2251_s16 }
  0x39   : > { %909 = vrot.lane.b32.xlu1 %v2348_v0, %s2255_s26  ;;  %913 = vrot.lane.b32.xlu0 %v2366_v4, %s2254_s25  ;;  %s1897_s26 = scalar_lea.hbm %s2647_s5, %s2005_s15 }
  0x3d   : > { %1224 = vrot.lane.b32.xlu1 %v2358_v2, %s2256_s30  ;;  %911 = vrot.lane.b32.xlu0 %v2360_v3, %s2254_s25 }
  0x41   : > { %1218 = vrot.lane.b32.xlu1 %v2348_v0, %s2257_s6  ;;  %1222 = vrot.lane.b32.xlu0 %v2366_v4, %s2256_s30  ;;  %s2184_s6 = scalar_lea.vmem %s1900_s23, 16 }
  0x42   : > { %p2185_p11 = scmp.ne.s32.totalorder %s1900_s23, %s2184_s6 }
  0x44   : > { %p2186_p12 = pnand %p2185_p11, %p2335_p5 }
  0x45   : > { %1384 = vrot.lane.b32.xlu1 %v2358_v2, %s2258_s7  ;;  %1220 = vrot.lane.b32.xlu0 %v2360_v3, %s2256_s30  ;;  %s1887_s30 = scalar_lea.sflag [#allocation3], %s215_s12 }
  0x46   : > { %p2187_p13 = pneg %p2186_p12 }
  0x49   : > { %1378 = vrot.lane.b32.xlu1 %v2348_v0, %s2259_s8  ;;  %1382 = vrot.lane.b32.xlu0 %v2366_v4, %s2258_s7 }
  0x4d   : > { %1544 = vrot.lane.b32.xlu1 %v2358_v2, %s2261_s9  ;;  %1380 = vrot.lane.b32.xlu0 %v2360_v3, %s2258_s7  ;;  %s2266_s7 = smov [#allocation2]  }
  0x4e   : > { %s2188_s8 = sshll.u32 %s2266_s7, 4  ;;  %s2189_s8 = int_to_ptr.vmem [resolvable:$false] %s2188_s8 }
  0x4f   : > { %s2190_s22 = scalar_lea.vmem %s2189_s8, 32  ;;  %p2191_p0 = scmp.lt.s32.totalorder %s1900_s23, %s2189_s8 }
  0x50   : > { %p2192_p1 = scmp.lt.s32.totalorder %s2190_s22, %s2184_s6 }
  0x51   : > { %1538 = vrot.lane.b32.xlu1 %v2348_v0, %s2262_s10  ;;  %1542 = vrot.lane.b32.xlu0 %v2366_v4, %s2261_s9  ;;  %s2264_s10 = smov 118  }
  0x52   : > { %p2193_p2 = por %p2192_p1, %p2191_p0 }
  0x54   : > { %p2194_p3 = pnand %p2193_p2, %p2187_p13 }
  0x55   : > { %1540 = vrot.lane.b32.xlu0 %v2360_v3, %s2261_s9 }
  0x59   : > { %1712 = vperm.xlu0 %2182, %v223_v6   ;;  %v249_v6 = vld [vmem:[%s2645_s3 + $0xc0] sm:$0xff] }
  0x86   : > { %v265_v7 = vpop.permute.xlu1 %264 }
  0x8b   : > { %v274_v8 = vpop.permute.xlu0 %273  ;;  %v270_v9 = vpop.permute.xlu1 %269 }
  0x8f   : > { %v436_v10 = vpop.permute.xlu1 %435  ;;  %v272_v11 = vpop.permute.xlu0 %271 }
  0x90   : > { %v277_v12 = vsel %vm275_vm0, %v272_v11, %v274_v8  ;;  %v276_v13 = vsel %vm275_vm0, %v270_v9, %v272_v11  ;;  %v260_v9 = vld [vmem:[%s2645_s3 + $0x118] sm:$0xff]  ;;  %v247_v11 = vld [vmem:[%s2645_s3 + $0xb0] sm:$0xff] }
  0x91   : > { %1959 = vmatprep.subr.msk.mxu1 %vm281_vm1, %v277_v12  ;;  %v259_v12 = vld [vmem:[%s2645_s3 + $0x110] sm:$0xff] }
  0x92   : > { %1960 = vmatpush1.msk.msra.mxu1 %vm281_vm1, %v276_v13  ;;  %v231_v13 = vld [vmem:[%s2645_s3 + $0x30] sm:$0xff] }
  0x93   : > { %v430_v14 = vpop.permute.xlu1 %429  ;;  %1961 = vmatmul.mubr.msk.f32.vlgmr.msra.gmra.mxu1 %vm278_vm2, %v265_v7  ;;  %2066 = vmatprep.subr.mxu1 %v2247_v1  ;;  %v434_v15 = vpop.permute.xlu0 %433 }
  0x94   : > { %v439_v16 = vsel %vm437_vm3, %v434_v15, %v436_v10  ;;  %2067 = vmatpush3.msk.msra.mxu1 %vm281_vm1, %v274_v8  ;;  %2068 = vmatprep.mubr.msk.f32.mxu1 %vm2263_vm4, %v2247_v1  ;;  %v248_v8 = vld [vmem:[%s2645_s3 + $0xb8] sm:$0xff] }
  0x95   : > { %1964 = vmatprep.subr.msk.mxu1 %vm281_vm1, %v439_v16  ;;  %v230_v16 = vld [vmem:[%s2645_s3 + $0x28] sm:$0xff] }
  0x97   : > { %v596_v17 = vpop.permute.xlu1 %595  ;;  %2069 = vmatmul.mubr.msk.f32.vlgmr.msra.gmra.mxu1 %vm278_vm2, %v265_v7  ;;  %v432_v18 = vpop.permute.xlu0 %431  ;;  %v233_v7 = vld [vmem:[%s2645_s3 + $0x40] sm:$0xff] }
  0x98   : > { %v438_v19 = vsel %vm437_vm3, %v432_v18, %v434_v15  ;;  %512 = vmatprep.mubr.f32.mxu1 %v2247_v1  ;;  %v258_v15 = vld [vmem:[%s2645_s3 + $0x108] sm:$0xff]  ;;  %v257_v18 = vld [vmem:[%s2645_s3 + $0x100] sm:$0xff] }
  0x99   : > { %1965 = vmatpush1.msk.msra.mxu1 %vm281_vm1, %v438_v19  ;;  %v229_v19 = vld [vmem:[%s2645_s3 + $0x20] sm:$0xff] }
  0x9a   : > { %2071 = vmatprep.subr.mxu1 %v2247_v1 }
  0x9b   : > { %v754_v20 = vpop.permute.xlu1 %753  ;;  %1966 = vmatmul.mubr.msk.f32.vlgmr.msra.gmra.mxu1 %vm278_vm2, %v430_v14  ;;  %v594_v21 = vpop.permute.xlu0 %593 }
  0x9c   : > { %2072 = vmatpush3.msk.msra.mxu1 %vm281_vm1, %v436_v10  ;;  %v599_v22 = vsel %vm597_vm5, %v594_v21, %v596_v17  ;;  %2073 = vmatprep.mubr.msk.f32.mxu1 %vm2263_vm4, %v2247_v1  ;;  %v232_v10 = vld [vmem:[%s2645_s3 + $0x38] sm:$0xff] }
  0x9d   : > { %1969 = vmatprep.subr.msk.mxu1 %vm281_vm1, %v599_v22  ;;  %v227_v22 = vld [vmem:[%s2645_s3 + $0x10] sm:$0xff] }
  0x9f   : > { %v752_v23 = vpop.permute.xlu1 %751  ;;  %2074 = vmatmul.mubr.msk.f32.vlgmr.msra.gmra.mxu1 %vm278_vm2, %v430_v14  ;;  %v592_v24 = vpop.permute.xlu0 %591  ;;  %v246_v14 = vld [vmem:[%s2645_s3 + $0xa8] sm:$0xff] }
  0xa0   : > { %v598_v25 = vsel %vm597_vm5, %v592_v24, %v594_v21  ;;  %672 = vmatprep.mubr.f32.mxu1 %v2247_v1  ;;  %v758_v29 = vsel %vm757_vm6, %v752_v23, %v754_v20  ;;  %v243_v21 = vld [vmem:[%s2645_s3 + $0x90] sm:$0xff]  ;;  %v242_v23 = vld [vmem:[%s2645_s3 + $0x88] sm:$0xff] }
  0xa1   : > { %1970 = vmatpush1.msk.msra.mxu1 %vm281_vm1, %v598_v25  ;;  %v226_v24 = vld [vmem:[%s2645_s3 + $0x8] sm:$0xff]  ;;  %v241_v25 = vld [vmem:[%s2645_s3 + $0x80] sm:$0xff] }
  0xa2   : > { %2076 = vmatprep.subr.mxu1 %v2247_v1 }
  0xa3   : > { %v750_v26 = vpop.permute.xlu1 %749  ;;  %v756_v27 = vpop.permute.xlu0 %755 }
  0xa4   : > { %v759_v28 = vsel %vm757_vm6, %v754_v20, %v756_v27  ;;  %v244_v20 = vld [vmem:[%s2645_s3 + $0x98] sm:$0xff] }
  0xa5   : > { %1974 = vmatprep.subr.msk.mxu0 %vm281_vm1, %v759_v28 }
  0xa6   : > { %1975 = vmatpush1.msk.msra.mxu0 %vm281_vm1, %v758_v29 }
  0xa7   : > { %v916_v30 = vpop.permute.xlu1 %915  ;;  %v590_v31 = vpop.permute.xlu0 %589  ;;  %1976 = vmatmul.mubr.msk.f32.vlgmr.msra.gmra.mxu0 %vm278_vm2, %v750_v26 }
  0xa8   : > { %1971 = vmatmul.mubr.msk.f32.vlgmr.msra.gmra.mxu1 %vm278_vm2, %v590_v31  ;;  %992 = vmatprep.mubr.f32.mxu0 %v2247_v1 }
  0xa9   : > { %2077 = vmatpush3.msk.msra.mxu1 %vm281_vm1, %v596_v17  ;;  %2078 = vmatprep.mubr.msk.f32.mxu1 %vm2263_vm4, %v2247_v1  ;;  %v245_v17 = vld [vmem:[%s2645_s3 + $0xa0] sm:$0xff] }
  0xaa   : > { %2081 = vmatprep.subr.mxu1 %v2247_v1 }
  0xab   : > { %v910_v32 = vpop.permute.xlu1 %909  ;;  %v914_v33 = vpop.permute.xlu0 %913 }
  0xac   : > { %v919_v34 = vsel %vm917_vm7, %v914_v33, %v916_v30  ;;  %2079 = vmatmul.mubr.msk.f32.vlgmr.msra.gmra.mxu1 %vm278_vm2, %v590_v31 }
  0xad   : > { %2082 = vmatpush3.msk.msra.mxu1 %vm281_vm1, %v756_v27  ;;  %1979 = vmatprep.subr.msk.mxu0 %vm281_vm1, %v919_v34 }
  0xae   : > { %2083 = vmatprep.mubr.msk.f32.mxu1 %vm2263_vm4, %v2247_v1  ;;  %2086 = vmatprep.subr.mxu1 %v2247_v1 }
  0xaf   : > { %v1225_v35 = vpop.permute.xlu1 %1224  ;;  %v912_v36 = vpop.permute.xlu0 %911 }
  0xb0   : > { %v918_v37 = vsel %vm917_vm7, %v912_v36, %v914_v33  ;;  %2084 = vmatmul.mubr.msk.f32.vlgmr.msra.gmra.mxu1 %vm278_vm2, %v750_v26  ;;  %v225_v26 = vld [vmem:[%s2645_s3] sm:$0xff] }
  0xb1   : > { %2087 = vmatpush3.msk.msra.mxu1 %vm281_vm1, %v916_v30  ;;  %1980 = vmatpush1.msk.msra.mxu0 %vm281_vm1, %v918_v37 }
  0xb2   : > { %1981 = vmatmul.mubr.msk.f32.vlgmr.msra.gmra.mxu0 %vm278_vm2, %v910_v32  ;;  %2088 = vmatprep.mubr.msk.f32.mxu1 %vm2263_vm4, %v2247_v1 }
  0xb3   : > { %v1219_v38 = vpop.permute.xlu1 %1218  ;;  %1984 = vmatprep.subr.msk.mxu0 %vm281_vm1, %v2366_v4  ;;  %v1223_v39 = vpop.permute.xlu0 %1222  ;;  %1141 = vmatprep.mubr.f32.mxu0 %v2247_v1  ;;  %v250_v4 = vld [vmem:[%s2645_s3 + $0xc8] sm:$0xff] }
  0xb4   : > { %v1228_v40 = vsel %vm1226_vm8, %v1223_v39, %v1225_v35  ;;  %2089 = vmatmul.mubr.msk.f32.vlgmr.msra.gmra.mxu1 %vm278_vm2, %v910_v32  ;;  %1985 = vmatpush1.msk.msra.mxu0 %vm281_vm1, %v2360_v3  ;;  %v235_v3 = vld [vmem:[%s2645_s3 + $0x50] sm:$0xff] }
  0xb5   : > { %2091 = vmatprep.subr.mxu1 %v2247_v1  ;;  %1989 = vmatprep.subr.msk.mxu0 %vm281_vm1, %v1228_v40 }
  0xb6   : > { %1986 = vmatmul.mubr.msk.f32.vlgmr.msra.gmra.mxu0 %vm278_vm2, %v2348_v0  ;;  %2092 = vmatpush3.msk.msra.mxu1 %vm281_vm1, %v2358_v2  ;;  %v251_v2 = vld [vmem:[%s2645_s3 + $0xd0] sm:$0xff] }
  0xb7   : > { %v1385_v41 = vpop.permute.xlu1 %1384  ;;  %2093 = vmatprep.mubr.msk.f32.mxu1 %vm2263_vm4, %v2247_v1  ;;  %2096 = vmatprep.subr.mxu1 %v2247_v1  ;;  %v1221_v42 = vpop.permute.xlu0 %1220 }
  0xb8   : > { %v1227_v43 = vsel %vm1226_vm8, %v1221_v42, %v1223_v39  ;;  %2094 = vmatmul.mubr.msk.f32.vlgmr.msra.gmra.mxu1 %vm278_vm2, %v2348_v0  ;;  %1301 = vmatprep.mubr.f32.mxu0 %v2247_v1  ;;  %v236_v0 = vld [vmem:[%s2645_s3 + $0x58] sm:$0xff] }
  0xb9   : > { %2097 = vmatpush3.msk.msra.mxu1 %vm281_vm1, %v1225_v35  ;;  %1990 = vmatpush1.msk.msra.mxu0 %vm281_vm1, %v1227_v43 }
  0xba   : > { %1991 = vmatmul.mubr.msk.f32.vlgmr.msra.gmra.mxu0 %vm278_vm2, %v1219_v38  ;;  %2098 = vmatprep.mubr.msk.f32.mxu1 %vm2263_vm4, %v2247_v1 }
  0xbb   : > { %v1379_v44 = vpop.permute.xlu1 %1378  ;;  %v1383_v45 = vpop.permute.xlu0 %1382  ;;  %2101 = vmatprep.subr.mxu1 %v2247_v1  ;;  %1461 = vmatprep.mubr.f32.mxu0 %v2247_v1 }
  0xbc   : > { %v1388_v46 = vsel %vm1386_vm9, %v1383_v45, %v1385_v41  ;;  %2099 = vmatmul.mubr.msk.f32.vlgmr.msra.gmra.mxu1 %vm278_vm2, %v1219_v38 }
  0xbd   : > { %1994 = vmatprep.subr.msk.mxu0 %vm281_vm1, %v1388_v46  ;;  %2102 = vmatpush3.msk.msra.mxu1 %vm281_vm1, %v1385_v41 }
  0xbe   : > { %2103 = vmatprep.mubr.msk.f32.mxu1 %vm2263_vm4, %v2247_v1  ;;  %2106 = vmatprep.subr.mxu1 %v2247_v1 }
  0xbf   : > { %v1545_v47 = vpop.permute.xlu1 %1544  ;;  %v1381_v48 = vpop.permute.xlu0 %1380 }
  0xc0   : > { %v1387_v49 = vsel %vm1386_vm9, %v1381_v48, %v1383_v45  ;;  %2104 = vmatmul.mubr.msk.f32.vlgmr.msra.gmra.mxu1 %vm278_vm2, %v1379_v44 }
  0xc1   : > { %1995 = vmatpush1.msk.msra.mxu0 %vm281_vm1, %v1387_v49  ;;  %2107 = vmatpush3.msk.msra.mxu1 %vm281_vm1, %v1545_v47 }
  0xc2   : > { %1996 = vmatmul.mubr.msk.f32.vlgmr.msra.gmra.mxu0 %vm278_vm2, %v1379_v44  ;;  %2108 = vmatprep.mubr.msk.f32.mxu1 %vm2263_vm4, %v2247_v1 }
  0xc3   : > { %v1539_v50 = vpop.permute.xlu1 %1538  ;;  %v1543_v51 = vpop.permute.xlu0 %1542  ;;  %1621 = vmatprep.mubr.f32.mxu0 %v2247_v1  ;;  %2111 = vmatprep.subr.mxu1 %v2247_v1 }
  0xc4   : > { %v1548_v52 = vsel %vm1546_vm10, %v1543_v51, %v1545_v47  ;;  %2109 = vmatmul.mubr.msk.f32.vlgmr.msra.gmra.mxu1 %vm278_vm2, %v1539_v50 }
  0xc5   : > { %1999 = vmatprep.subr.msk.mxu0 %vm281_vm1, %v1548_v52  ;;  %2119 = vmatprep.mubr.msk.f32.mxu1 %vm2263_vm4, %v2247_v1 }
  0xc6   : > { %2112 = vmatpush3.msra.mxu1 %v260_v9 }
  0xc7   : > { %v1541_v53 = vpop.permute.xlu0 %1540  ;;  %2113 = vmatprep.subr.mxu1 %v2247_v1 }
  0xc8   : > { %v1547_v54 = vsel %vm1546_vm10, %v1541_v53, %v1543_v51  ;;  %2114 = vmatpush3.msra.mxu1 %v259_v12 }
  0xc9   : > { %2000 = vmatpush1.msk.msra.mxu0 %vm281_vm1, %v1547_v54  ;;  %2115 = vmatprep.subr.mxu1 %v2247_v1 }
  0xca   : > { %2001 = vmatmul.mubr.msk.f32.vlgmr.msra.gmra.mxu0 %vm278_vm2, %v1539_v50  ;;  %2026 = vmatprep.subr.mxu0 %v256_v55 }
  0xcb   : > { %2027 = vmatpush3.msra.mxu0 %v240_v56  ;;  %2116 = vmatpush3.msra.mxu1 %v258_v15 }
  0xcc   : > { %2028 = vmatprep.subr.mxu0 %v255_v57  ;;  %2117 = vmatprep.subr.mxu1 %v2247_v1  ;;  %v228_v1 = vld [vmem:[%s2645_s3 + $0x18] sm:$0xff] }
  0xcd   : > { %2029 = vmatpush3.msra.mxu0 %v239_v58  ;;  %2118 = vmatpush3.msra.mxu1 %v257_v18 }
  0xce   : > { %2030 = vmatprep.subr.mxu0 %v254_v59 }
  0xcf   : > { %2031 = vmatpush3.msra.mxu0 %v238_v60 }
  0xd0   : > { %2032 = vmatprep.subr.mxu0 %v253_v61 }
  0xd1   : > { %2033 = vmatpush3.msra.mxu0 %v237_v62 }
  0xd2   : > { %2034 = vmatprep.subr.mxu0 %v252_v63 }
  0xd3   : > { %2035 = vmatpush3.msra.mxu0 %v236_v0 }
  0xd4   : > { %2036 = vmatprep.subr.mxu0 %v251_v2 }
  0xd5   : > { %2037 = vmatpush3.msra.mxu0 %v235_v3 }
  0xd6   : > { %2038 = vmatprep.subr.mxu0 %v250_v4 }
  0xd7   : > { %2039 = vmatpush3.msra.mxu0 %v234_v5 }
  0xd8   : > { %2040 = vmatprep.subr.mxu0 %v249_v6 }
  0xd9   : > { %2041 = vmatpush3.msra.mxu0 %v233_v7 }
  0xda   : > { %2042 = vmatprep.subr.mxu0 %v248_v8  ;;  %v1713_v8 = vpop.permute.xlu0 %1712 }
  0xdb   : > { %2043 = vmatpush3.msra.mxu0 %v232_v10 }
  0xdc   : > { %2044 = vmatprep.subr.mxu0 %v247_v11 }
  0xdd   : > { %2045 = vmatpush3.msra.mxu0 %v231_v13 }
  0xde   : > { %2046 = vmatprep.subr.mxu0 %v246_v14 }
  0xdf   : > { %2047 = vmatpush3.msra.mxu0 %v230_v16 }
  0xe0   : > { %2048 = vmatprep.subr.mxu0 %v245_v17 }
  0xe1   : > { %2049 = vmatpush3.msra.mxu0 %v229_v19 }
  0xe2   : > { %2050 = vmatprep.subr.mxu0 %v244_v20 }
  0xe3   : > { %2051 = vmatpush3.msra.mxu0 %v228_v1 }
  0xe4   : > { %2052 = vmatprep.subr.mxu0 %v243_v21 }
  0xe5   : > { %2053 = vmatpush3.msra.mxu0 %v227_v22 }
  0xe6   : > { %2054 = vmatprep.subr.mxu0 %v242_v23 }
  0xe7   : > { %2055 = vmatpush3.msra.mxu0 %v226_v24 }
  0xe8   : > { %2056 = vmatprep.subr.mxu0 %v241_v25 }
  0xe9   : > { %2057 = vmatpush3.msra.mxu0 %v225_v26 }
 0x153   : > { %v354_v27 = vpop.f32.mrf.mxu1 }
 0x155   : > { %v356_v28 = vpop.f32.mrf.mxu1 }
 0x157   : > { %v425_v29 = vpop.f32.mrf.mxu1 }
 0x159   : > { %v2070_v30 = vpop.f32.mrf.mxu1 }
 0x15b   : > { %v514_v31 = vpop.f32.mrf.mxu1 }
 0x15d   : > { %v516_v32 = vpop.f32.mrf.mxu1 }
 0x15f   : > { %v585_v33 = vpop.f32.mrf.mxu1 }
 0x161   : > { %v2075_v34 = vpop.f32.mrf.mxu1 }
 0x167   : > { %v834_v37 = vpop.f32.mrf.mxu0 }
 0x168   : > { %v674_v35 = vpop.f32.mrf.mxu1 }
 0x169   : > { %v836_v40 = vpop.f32.mrf.mxu0 }
 0x16a   : > { %v676_v36 = vpop.f32.mrf.mxu1 }
 0x16c   : > { %v745_v38 = vpop.f32.mrf.mxu1 }
 0x16e   : > { %v2080_v39 = vpop.f32.mrf.mxu1 }
 0x170   : > { %v905_v41 = vpop.f32.mrf.mxu1 }
 0x172   : > { %v2085_v42 = vpop.f32.mrf.mxu1  ;;  %v994_v43 = vpop.f32.mrf.mxu0 }
 0x174   : > { %v996_v44 = vpop.f32.mrf.mxu0  ;;  %v1065_v45 = vpop.f32.mrf.mxu1 }
 0x176   : > { %v2090_v46 = vpop.f32.mrf.mxu1  ;;  %v1143_v47 = vpop.f32.mrf.mxu0 }
 0x177   : > { %v1144_v6 = vadd.f32 %v1143_v47, %v354_v27 }
 0x178   : > { %v1214_v48 = vpop.f32.mrf.mxu1  ;;  %v1145_v49 = vpop.f32.mrf.mxu0 }
 0x179   : > { %v1215_v60 = vadd.f32 %v1214_v48, %v425_v29  ;;  %v1146_v13 = vadd.f32 %v1145_v49, %v356_v28 }
 0x17a   : > { %v2095_v50 = vpop.f32.mrf.mxu1  ;;  %v1303_v52 = vpop.f32.mrf.mxu0 }
 0x17b   : > { %v1304_v3 = vadd.f32 %v1303_v52, %v514_v31 }
 0x17c   : > { %v1374_v51 = vpop.f32.mrf.mxu1  ;;  %v1305_v55 = vpop.f32.mrf.mxu0 }
 0x17d   : > { %v1375_v57 = vadd.f32 %v1374_v51, %v585_v33  ;;  %v1306_v9 = vadd.f32 %v1305_v55, %v516_v32  ;;  %v1698_v14 = vadd.f32 %v1304_v3, %v1144_v6 }
 0x17e   : > { %v2100_v53 = vpop.f32.mrf.mxu1 }
 0x17f   : > { %v1700_v0 = vadd.f32 %v1375_v57, %v1215_v60  ;;  %v1699_v20 = vadd.f32 %v1306_v9, %v1146_v13 }
 0x180   : > { %v1534_v54 = vpop.f32.mrf.mxu1 }
 0x181   : > { %v1535_v61 = vadd.f32 %v1534_v54, %v745_v38 }
 0x182   : > { %v2105_v56 = vpop.f32.mrf.mxu1  ;;  %v1463_v58 = vpop.f32.mrf.mxu0 }
 0x183   : > { %v1464_v10 = vadd.f32 %v1463_v58, %v674_v35 }
 0x184   : > { %v1694_v59 = vpop.f32.mrf.mxu1  ;;  %v1465_v4 = vpop.f32.mrf.mxu0 }
 0x185   : > { %v1695_v62 = vadd.f32 %v1694_v59, %v905_v41  ;;  %v1466_v16 = vadd.f32 %v1465_v4, %v676_v36 }
 0x186   : > { %v2110_v63 = vpop.f32.mrf.mxu1 }
 0x187   : > { %v1703_v2 = vadd.f32 %v1695_v62, %v1535_v61 }
 0x189   : > { %v1706_v5 = vadd.f32 %v1703_v2, %v1700_v0 }
 0x18a   : > { %v1623_v7 = vpop.f32.mrf.mxu0 }
 0x18b   : > { %v1624_v11 = vadd.f32 %v1623_v7, %v834_v37  ;;  %v1709_v12 = vadd.f32 %v1706_v5, %v1065_v45 }
 0x18c   : > { %v1625_v15 = vpop.f32.mrf.mxu0 }
 0x18d   : > { %v1701_v17 = vadd.f32 %v1624_v11, %v1464_v10  ;;  %v1626_v18 = vadd.f32 %v1625_v15, %v836_v40  ;;  %v1717_v19 = vadd.f32 %v1713_v8, %v1709_v12 }
 0x18f   : > { %v1704_v1 = vadd.f32 %v1701_v17, %v1698_v14  ;;  %v1702_v21 = vadd.f32 %v1626_v18, %v1466_v16  ;;  %v1720_v22 = vmax.f32 %v1717_v19, 0.0 }
 0x191   : > { %v1705_v23 = vadd.f32 %v1702_v21, %v1699_v20  ;;  %v1707_v24 = vadd.f32 %v1704_v1, %v994_v43  ;;  %2120 = vmatmul.mubr.msk.f32.vlgmr.msra.gmra.mxu1 %vm1721_vm11, %v1720_v22  ;;  %v224_v43 = vld [vmem:[%s2646_s4] sm:$0x1] }
 0x193   : > { %v1708_v25 = vadd.f32 %v1705_v23, %v996_v44  ;;  %v1715_v26 = vadd.f32 %v1713_v8, %v1707_v24 }
 0x195   : > { %v1716_v27 = vadd.f32 %v1713_v8, %v1708_v25  ;;  %v1718_v30 = vmax.f32 %v1715_v26, 0.0 }
 0x197   : > { %v1719_v29 = vmax.f32 %v1716_v27, 0.0 }
 0x199   : > { %1789 = vmatprep.mubr.f32.mxu0 %v1719_v29 }
 0x19a   : > { %1790 = vmatmul.mubr.f32.vlgmr.msra.gmra.mxu0 %v1718_v30 }
 0x251   : > { %v1861_v28 = vpop.f32.mrf.mxu1 }
 0x253   : > { %v2121_v31 = vpop.f32.mrf.mxu1 }
 0x25a   : > { %v2058_v32 = vpop.f32.mrf.mxu0 }
 0x25c   : > { %v2059_v33 = vpop.f32.mrf.mxu0 }
 0x25d   : > { %v2060_v34 = vadd.f32 %v2059_v33, %v2058_v32 }
 0x25f   : > { %v1862_v35 = vadd.f32 %v2060_v34, %v1861_v28 }
 0x261   : > { %v1866_v36 = vrot.slane %v1862_v35, 1 }
 0x263   : > { %1867 = vrot.lane.b32.xlu1 %v1866_v36, %s2264_s10 }
 0x2d5   : > { %v1868_v37 = vpop.permute.xlu1 %1867 }
 0x2d6   : > { %v1870_v38 = vadd.f32 %v1868_v37, %v1862_v35 }
 0x2d8   : > { %v1872_v39 = vrot.slane %v1870_v38, 2 }
 0x2da   : > { %1873 = vrot.lane.b32.xlu1 %v1872_v39, %s2251_s16 }
 0x34c   : > { %v1874_v40 = vpop.permute.xlu1 %1873 }
 0x34d   : > { %v1876_v41 = vadd.f32 %v1874_v40, %v1870_v38 }
 0x34f   : > { %v1878_v42 = vrot.slane %v1876_v41, 4 }
 0x351   : > { %1879 = vrot.lane.b32.xlu0 %v1878_v42, %s2265_s11 }
 0x3c3   : > { %v1880_v44 = vpop.permute.xlu0 %1879 }
 0x3c4   : > { %v1882_v45 = vadd.f32 %v1880_v44, %v1876_v41 }
 0x3c6   : > { %v1883_v46 = vadd.f32 %v1882_v45, %v224_v43 }
 0x3c8   : > { %1885 = vst.msk [vmem:[%s216_s17] sm:$0x1] %vm1884_vm12, %v1883_v46 }
 0x3c9   : > { %2197 = shalt.err (!%p2194_p3)
}
 0x3ca   : > { %s2198_s9 = scalar_lea.hbm %s1897_s26, 16  ;;  %s2202_s12 = scalar_lea.hbm %s2647_s5, 32 }
 0x3cb   : > { %p2199_p4 = scmp.ne.s32.totalorder %s1897_s26, %s2198_s9  ;;  %p2203_p9 = scmp.lt.s32.totalorder %s1897_s26, %s2647_s5 }
 0x3cc   : > { %p2204_p10 = scmp.lt.s32.totalorder %s2202_s12, %s2198_s9 }
 0x3cd   : > { %p2200_p7 = pnand %p2199_p4, %p2335_p5 }
 0x3ce   : > { %p2205_p11 = por %p2204_p10, %p2203_p9 }
 0x3cf   : > { %p2201_p8 = pneg %p2200_p7 }
 0x3d1   : > { %p2206_p12 = pnand %p2205_p11, %p2201_p8 }
 0x3d3   : > { %2209 = shalt.err (!%p2206_p12)
}
 0x3d4   : > { %2123 = dma.vmem_to_hbm [thread:$0]  (%p2335_p5), %s1900_s23, 16, %s1897_s26, %s1887_s30  }
 0x3d5 PF: > { %p2129_p13 = scmp.ge.s32.totalorder %s2244_s21, 2  ;;  %s1911_s15 = sand.u32 1, %s2232_s18  }
 0x3d6   : > { %s1912_s17 = scalar_lea.sflag [#allocation3], %s1911_s15 }
 0x3d7   : > { %p2126_p0 = pnand %p2129_p13, %p2339_p6 }
 0x3d9   : > { %p2127_p1 = pneg %p2126_p0 }
 0x3db   : > { %2227 = dma.done.wait (%p2127_p1), %s1912_s17, 16  }
 0x3dc   : > { %2229 = vsyncadd (%p2127_p1), %s1912_s17, 4294967280  ;;  %p15_p2 = scmp.ge.s32.totalorder %s2322_s24, 4   ;;  %s2650_s18 = smov %s2236_s19 }
 0x3dd   : > { %s2651_s19 = smov %s2240_s20  ;;  %s2652_s20 = smov %s2333_s27 }
 0x3de   : > { %s2653_s21 = smov %s2322_s24  ;;  %17 = sbr.rel (!%p15_p2) target bundleno = 3 (0x3), region = 75 }
 0x3e3   :  { %1916 = vsyncpa [#allocation3], 1 }
 0x3e4   :  { %1918 = vsyncpa [#allocation3 + $0x1], 1 }

</bundles_post_ra>
